<compile_context>
chip_gen: v7x
topology: tpu7x:2x2x1
jax: 0.10.0
libtpu: 0.0.40
codegen_flags: <defaults>
</compile_context>

<pallas_src>
import jax
import jax.numpy as jnp
from jax.experimental import pallas as pl
from jax.experimental.pallas import tpu as pltpu


def reconstruct_net_kernel(x_ref, w1_ref, b1_ref, w2_ref, b2_ref,
                           w3_ref, b3_ref, o_ref):
    """fc = ReLU -> Linear(E,H) -> ReLU -> Linear(H,H) -> ReLU -> Linear(H,O)."""
    w_dtype = w1_ref.dtype
    # nn.Sequential starts with a ReLU on the input.
    x = jnp.maximum(x_ref[...], 0.0)
    # All dots accumulate in f32 on the MXU; bias-add/ReLU stay in f32, then
    # cast back to the weight dtype (no-op for f32, bf16 for the fast path).
    h = jnp.dot(x, w1_ref[...], preferred_element_type=jnp.float32) + b1_ref[...]
    h = jnp.maximum(h, 0.0).astype(w_dtype)
    h = jnp.dot(h, w2_ref[...], preferred_element_type=jnp.float32) + b2_ref[...]
    h = jnp.maximum(h, 0.0).astype(w_dtype)
    out = jnp.dot(h, w3_ref[...], preferred_element_type=jnp.float32) + b3_ref[...]
    o_ref[...] = out.astype(o_ref.dtype)


def _round_up(n, m):
    return ((n + m - 1) // m) * m


def _choose_tile_b(B, cap=512):
    """Pick the batch tile.

    Per-grid-step overhead is ~0.35us and tile_b is the MXU M dimension, so we
    want the biggest tile that (a) divides B, (b) keeps the resident f32
    activation slab under roughly half the vreg file (~512 rows at these
    hidden sizes).  When B <= cap we collapse to a single block (no grid-step
    overhead at all), which is the only thing that matters at toy sizes.
    """
    if B <= cap:
        return B
    best = 0
    for t in range(8, cap + 1, 8):
        if B % t == 0:
            best = t
    return best if best else B  # fall back to a single (large) block


def reconstruct_net(x, w1, b1, w2, b2, w3, b3, *, tile_b=None,
                    compute_dtype=None):
    """x: (B, E). Weights wi: (in, out). Biases bi: (1, out). Returns f32 (B, O)."""
    B, E = x.shape
    H1 = w1.shape[1]
    O = w3.shape[1]

    # Optional bf16 MXU inputs (v6e/v7x); biases stay f32 for the epilogue.
    if compute_dtype is not None:
        x = x.astype(compute_dtype)
        w1 = w1.astype(compute_dtype)
        w2 = w2.astype(compute_dtype)
        w3 = w3.astype(compute_dtype)
    b1 = b1.astype(jnp.float32)
    b2 = b2.astype(jnp.float32)
    b3 = b3.astype(jnp.float32)

    # Lane-dense output: zero-pad the output feature dim to a multiple of 128
    # so stores are unmasked full-lane vst; slice back after the call.
    O_pad = _round_up(O, 128)
    if O_pad != O:
        w3 = jnp.pad(w3, ((0, 0), (0, O_pad - O)))
        b3 = jnp.pad(b3, ((0, 0), (0, O_pad - O)))

    if tile_b is None:
        tile_b = _choose_tile_b(B)
    assert B % tile_b == 0, "batch must be divisible by tile_b"
    grid = (B // tile_b,)

    def _call(single_buffer_weights):
        def wspec(shape):
            # Weights/biases are grid-invariant (index_map always (0, 0)):
            # request single buffering to halve their VMEM footprint.
            if single_buffer_weights:
                return pl.BlockSpec(shape, lambda i: (0, 0),
                                    pipeline_mode=pl.Buffered(1))
            return pl.BlockSpec(shape, lambda i: (0, 0))

        return pl.pallas_call(
            reconstruct_net_kernel,
            out_shape=jax.ShapeDtypeStruct((B, O_pad), jnp.float32),
            grid_spec=pltpu.PrefetchScalarGridSpec(
                num_scalar_prefetch=0,
                grid=grid,
                in_specs=[
                    pl.BlockSpec((tile_b, E), lambda i: (i, 0)),  # x tile
                    wspec((E, H1)),      # w1
                    wspec((1, H1)),      # b1
                    wspec((H1, H1)),     # w2
                    wspec((1, H1)),      # b2
                    wspec((H1, O_pad)),  # w3 (lane-padded)
                    wspec((1, O_pad)),   # b3 (lane-padded)
                ],
                out_specs=pl.BlockSpec((tile_b, O_pad), lambda i: (i, 0)),
            ),
            compiler_params=pltpu.CompilerParams(
                dimension_semantics=("parallel",)),
        )(x, w1, b1, w2, b2, w3, b3)

    try:
        out = _call(single_buffer_weights=True)
    except Exception:
        # Older/newer Pallas versions may reject buffer_count=1; default
        # double buffering is functionally identical (just more VMEM).
        out = _call(single_buffer_weights=False)

    return out[:, :O] if O_pad != O else out


def _init_linear(key, fan_in, fan_out):
    """Deterministic init mimicking PyTorch nn.Linear default (U(+-1/sqrt(fan_in))).
    Returns W as (in, out) and b as (1, out)."""
    kw, kb = jax.random.split(key)
    bound = 1.0 / jnp.sqrt(fan_in)
    w = jax.random.uniform(kw, (fan_in, fan_out), jnp.float32, -bound, bound)
    b = jax.random.uniform(kb, (1, fan_out), jnp.float32, -bound, bound)
    return w, b


if __name__ == "__main__":
    # Small shapes consistent with the module: embedding_dim=32, hidden_1=64,
    # output=16, batch=16.
    embedding_dim, hidden_1, output = 32, 64, 16
    batch = 16

    key = jax.random.PRNGKey(0)
    kx, k1, k2, k3 = jax.random.split(key, 4)

    x = jax.random.normal(kx, (batch, embedding_dim), jnp.float32)
    w1, b1 = _init_linear(k1, embedding_dim, hidden_1)
    w2, b2 = _init_linear(k2, hidden_1, hidden_1)
    w3, b3 = _init_linear(k3, hidden_1, output)

    # Pure-JAX reference of the same math.
    def ref(xv):
        h = jnp.maximum(xv, 0.0)
        h = jnp.maximum(h @ w1 + b1, 0.0)
        h = jnp.maximum(h @ w2 + b2, 0.0)
        return h @ w3 + b3

    expected = ref(x)

    # f32 path: exact match with the reference.
    out = reconstruct_net(x, w1, b1, w2, b2, w3, b3)
    out = jax.block_until_ready(out)
    assert out.shape == (batch, output)
    assert jnp.allclose(out, expected, atol=1e-5, rtol=1e-5)

    # bf16 MXU-input path (v6e/v7x fast path), f32 accumulation: looser check.
    out_bf16 = reconstruct_net(x, w1, b1, w2, b2, w3, b3,
                               compute_dtype=jnp.bfloat16)
    out_bf16 = jax.block_until_ready(out_bf16)
    assert out_bf16.shape == (batch, output)
    assert jnp.allclose(out_bf16, expected, atol=5e-2, rtol=5e-2)

    print("KERNEL_OK")
</pallas_src>

<mosaic_0001>
module attributes {stable_mosaic.version = 11 : i64} {
  func.func @reconstruct_net_kernel(%arg0: i32, %arg1: memref<16x32xf32, #tpu.memory_space<vmem>>, %arg2: memref<32x64xf32, #tpu.memory_space<vmem>>, %arg3: memref<1x64xf32, #tpu.memory_space<vmem>>, %arg4: memref<64x64xf32, #tpu.memory_space<vmem>>, %arg5: memref<1x64xf32, #tpu.memory_space<vmem>>, %arg6: memref<64x128xf32, #tpu.memory_space<vmem>>, %arg7: memref<1x128xf32, #tpu.memory_space<vmem>>, %arg8: memref<16x128xf32, #tpu.memory_space<vmem>>) attributes {dimension_semantics = [#tpu.dimension_semantics<parallel>], iteration_bounds = array<i64: 1>, scalar_prefetch = 0 : i64, scratch_operands = 0 : i64, tpu.core_type = #tpu.core_type<tc>, window_params = [{transform_indices = @transform_0, window_bounds = array<i64: 16, 32>}, {pipeline_mode = #tpu.pipeline_mode<synchronous>, transform_indices = @transform_1, window_bounds = array<i64: 32, 64>}, {pipeline_mode = #tpu.pipeline_mode<synchronous>, transform_indices = @transform_2, window_bounds = array<i64: 1, 64>}, {pipeline_mode = #tpu.pipeline_mode<synchronous>, transform_indices = @transform_3, window_bounds = array<i64: 64, 64>}, {pipeline_mode = #tpu.pipeline_mode<synchronous>, transform_indices = @transform_4, window_bounds = array<i64: 1, 64>}, {pipeline_mode = #tpu.pipeline_mode<synchronous>, transform_indices = @transform_5, window_bounds = array<i64: 64, 128>}, {pipeline_mode = #tpu.pipeline_mode<synchronous>, transform_indices = @transform_6, window_bounds = array<i64: 1, 128>}, {transform_indices = @transform_7, window_bounds = array<i64: 16, 128>}]} {
    %c0 = arith.constant 0 : index
    %c0_0 = arith.constant 0 : index
    %0 = vector.load %arg1[%c0, %c0_0] : memref<16x32xf32, #tpu.memory_space<vmem>>, vector<16x32xf32>
    %cst = arith.constant 0.000000e+00 : f32
    %1 = vector.broadcast %cst : f32 to vector<16x32xf32>
    %2 = arith.maximumf %0, %1 : vector<16x32xf32>
    %c0_1 = arith.constant 0 : index
    %c0_2 = arith.constant 0 : index
    %3 = vector.load %arg2[%c0_1, %c0_2] : memref<32x64xf32, #tpu.memory_space<vmem>>, vector<32x64xf32>
    %cst_3 = arith.constant dense<0.000000e+00> : vector<16x64xf32>
    %4 = tpu.matmul %2, %3, %cst_3 {dimension_numbers = #tpu.dot_dimension_numbers<[1], [0], [0], [1], [0, 0, 1, 1], [], []>} : vector<16x32xf32>, vector<32x64xf32>, vector<16x64xf32> -> vector<16x64xf32>
    %c0_4 = arith.constant 0 : index
    %c0_5 = arith.constant 0 : index
    %5 = vector.load %arg3[%c0_4, %c0_5] : memref<1x64xf32, #tpu.memory_space<vmem>>, vector<1x64xf32>
    %6 = vector.broadcast %5 : vector<1x64xf32> to vector<16x64xf32>
    %7 = arith.addf %4, %6 : vector<16x64xf32>
    %cst_6 = arith.constant 0.000000e+00 : f32
    %8 = vector.broadcast %cst_6 : f32 to vector<16x64xf32>
    %9 = arith.maximumf %7, %8 : vector<16x64xf32>
    %c0_7 = arith.constant 0 : index
    %c0_8 = arith.constant 0 : index
    %10 = vector.load %arg4[%c0_7, %c0_8] : memref<64x64xf32, #tpu.memory_space<vmem>>, vector<64x64xf32>
    %cst_9 = arith.constant dense<0.000000e+00> : vector<16x64xf32>
    %11 = tpu.matmul %9, %10, %cst_9 {dimension_numbers = #tpu.dot_dimension_numbers<[1], [0], [0], [1], [0, 0, 1, 1], [], []>} : vector<16x64xf32>, vector<64x64xf32>, vector<16x64xf32> -> vector<16x64xf32>
    %c0_10 = arith.constant 0 : index
    %c0_11 = arith.constant 0 : index
    %12 = vector.load %arg5[%c0_10, %c0_11] : memref<1x64xf32, #tpu.memory_space<vmem>>, vector<1x64xf32>
    %13 = vector.broadcast %12 : vector<1x64xf32> to vector<16x64xf32>
    %14 = arith.addf %11, %13 : vector<16x64xf32>
    %cst_12 = arith.constant 0.000000e+00 : f32
    %15 = vector.broadcast %cst_12 : f32 to vector<16x64xf32>
    %16 = arith.maximumf %14, %15 : vector<16x64xf32>
    %c0_13 = arith.constant 0 : index
    %c0_14 = arith.constant 0 : index
    %17 = vector.load %arg6[%c0_13, %c0_14] : memref<64x128xf32, #tpu.memory_space<vmem>>, vector<64x128xf32>
    %cst_15 = arith.constant dense<0.000000e+00> : vector<16x128xf32>
    %18 = tpu.matmul %16, %17, %cst_15 {dimension_numbers = #tpu.dot_dimension_numbers<[1], [0], [0], [1], [0, 0, 1, 1], [], []>} : vector<16x64xf32>, vector<64x128xf32>, vector<16x128xf32> -> vector<16x128xf32>
    %c0_16 = arith.constant 0 : index
    %c0_17 = arith.constant 0 : index
    %19 = vector.load %arg7[%c0_16, %c0_17] : memref<1x128xf32, #tpu.memory_space<vmem>>, vector<1x128xf32>
    %20 = vector.broadcast %19 : vector<1x128xf32> to vector<16x128xf32>
    %21 = arith.addf %18, %20 : vector<16x128xf32>
    %c0_18 = arith.constant 0 : index
    %c0_19 = arith.constant 0 : index
    %22 = vector.load %arg8[%c0_18, %c0_19] : memref<16x128xf32, #tpu.memory_space<vmem>>, vector<16x128xf32>
    tpu.vector_store %arg8[%c0_18, %c0_19], %21 {strides = array<i32>} : memref<16x128xf32, #tpu.memory_space<vmem>>, vector<16x128xf32>,
    return
  }
  func.func @transform_0(%arg0: i32) -> (i32, i32) {
    %c0_i32 = arith.constant 0 : i32
    %c0_i32_0 = arith.constant 0 : i32
    return %arg0, %c0_i32 : i32, i32
  }
  func.func @transform_1(%arg0: i32) -> (i32, i32) {
    %c0_i32 = arith.constant 0 : i32
    %c0_i32_0 = arith.constant 0 : i32
    %c0_i32_1 = arith.constant 0 : i32
    return %c0_i32, %c0_i32_0 : i32, i32
  }
  func.func @transform_2(%arg0: i32) -> (i32, i32) {
    %c0_i32 = arith.constant 0 : i32
    %c0_i32_0 = arith.constant 0 : i32
    %c0_i32_1 = arith.constant 0 : i32
    return %c0_i32, %c0_i32_0 : i32, i32
  }
  func.func @transform_3(%arg0: i32) -> (i32, i32) {
    %c0_i32 = arith.constant 0 : i32
    %c0_i32_0 = arith.constant 0 : i32
    %c0_i32_1 = arith.constant 0 : i32
    return %c0_i32, %c0_i32_0 : i32, i32
  }
  func.func @transform_4(%arg0: i32) -> (i32, i32) {
    %c0_i32 = arith.constant 0 : i32
    %c0_i32_0 = arith.constant 0 : i32
    %c0_i32_1 = arith.constant 0 : i32
    return %c0_i32, %c0_i32_0 : i32, i32
  }
  func.func @transform_5(%arg0: i32) -> (i32, i32) {
    %c0_i32 = arith.constant 0 : i32
    %c0_i32_0 = arith.constant 0 : i32
    %c0_i32_1 = arith.constant 0 : i32
    return %c0_i32, %c0_i32_0 : i32, i32
  }
  func.func @transform_6(%arg0: i32) -> (i32, i32) {
    %c0_i32 = arith.constant 0 : i32
    %c0_i32_0 = arith.constant 0 : i32
    %c0_i32_1 = arith.constant 0 : i32
    return %c0_i32, %c0_i32_0 : i32, i32
  }
  func.func @transform_7(%arg0: i32) -> (i32, i32) {
    %c0_i32 = arith.constant 0 : i32
    %c0_i32_0 = arith.constant 0 : i32
    return %arg0, %c0_i32 : i32, i32
  }
}

module attributes {stable_mosaic.version = 11 : i64} {
  func.func @reconstruct_net_kernel(%arg0: i32, %arg1: memref<16x32xf32, #tpu.memory_space<vmem>>, %arg2: memref<32x64xf32, #tpu.memory_space<vmem>>, %arg3: memref<1x64xf32, #tpu.memory_space<vmem>>, %arg4: memref<64x64xf32, #tpu.memory_space<vmem>>, %arg5: memref<1x64xf32, #tpu.memory_space<vmem>>, %arg6: memref<64x128xf32, #tpu.memory_space<vmem>>, %arg7: memref<1x128xf32, #tpu.memory_space<vmem>>, %arg8: memref<16x128xf32, #tpu.memory_space<vmem>>) attributes {dimension_semantics = [#tpu.dimension_semantics<parallel>], iteration_bounds = array<i64: 1>, scalar_prefetch = 0 : i64, scratch_operands = 0 : i64, tpu.core_type = #tpu.core_type<tc>, window_params = [{transform_indices = @transform_0, window_bounds = array<i64: 16, 32>}, {pipeline_mode = #tpu.pipeline_mode<synchronous>, transform_indices = @transform_1, window_bounds = array<i64: 32, 64>}, {pipeline_mode = #tpu.pipeline_mode<synchronous>, transform_indices = @transform_2, window_bounds = array<i64: 1, 64>}, {pipeline_mode = #tpu.pipeline_mode<synchronous>, transform_indices = @transform_3, window_bounds = array<i64: 64, 64>}, {pipeline_mode = #tpu.pipeline_mode<synchronous>, transform_indices = @transform_4, window_bounds = array<i64: 1, 64>}, {pipeline_mode = #tpu.pipeline_mode<synchronous>, transform_indices = @transform_5, window_bounds = array<i64: 64, 128>}, {pipeline_mode = #tpu.pipeline_mode<synchronous>, transform_indices = @transform_6, window_bounds = array<i64: 1, 128>}, {transform_indices = @transform_7, window_bounds = array<i64: 16, 128>}]} {
    %c0 = arith.constant 0 : index
    %c0_0 = arith.constant 0 : index
    %0 = vector.load %arg1[%c0, %c0_0] : memref<16x32xf32, #tpu.memory_space<vmem>>, vector<16x32xf32>
    %cst = arith.constant 0.000000e+00 : f32
    %1 = vector.broadcast %cst : f32 to vector<16x32xf32>
    %2 = arith.maximumf %0, %1 : vector<16x32xf32>
    %c0_1 = arith.constant 0 : index
    %c0_2 = arith.constant 0 : index
    %3 = vector.load %arg2[%c0_1, %c0_2] : memref<32x64xf32, #tpu.memory_space<vmem>>, vector<32x64xf32>
    %cst_3 = arith.constant dense<0.000000e+00> : vector<16x64xf32>
    %4 = tpu.matmul %2, %3, %cst_3 {dimension_numbers = #tpu.dot_dimension_numbers<[1], [0], [0], [1], [0, 0, 1, 1], [], []>} : vector<16x32xf32>, vector<32x64xf32>, vector<16x64xf32> -> vector<16x64xf32>
    %c0_4 = arith.constant 0 : index
    %c0_5 = arith.constant 0 : index
    %5 = vector.load %arg3[%c0_4, %c0_5] : memref<1x64xf32, #tpu.memory_space<vmem>>, vector<1x64xf32>
    %6 = vector.broadcast %5 : vector<1x64xf32> to vector<16x64xf32>
    %7 = arith.addf %4, %6 : vector<16x64xf32>
    %cst_6 = arith.constant 0.000000e+00 : f32
    %8 = vector.broadcast %cst_6 : f32 to vector<16x64xf32>
    %9 = arith.maximumf %7, %8 : vector<16x64xf32>
    %c0_7 = arith.constant 0 : index
    %c0_8 = arith.constant 0 : index
    %10 = vector.load %arg4[%c0_7, %c0_8] : memref<64x64xf32, #tpu.memory_space<vmem>>, vector<64x64xf32>
    %cst_9 = arith.constant dense<0.000000e+00> : vector<16x64xf32>
    %11 = tpu.matmul %9, %10, %cst_9 {dimension_numbers = #tpu.dot_dimension_numbers<[1], [0], [0], [1], [0, 0, 1, 1], [], []>} : vector<16x64xf32>, vector<64x64xf32>, vector<16x64xf32> -> vector<16x64xf32>
    %c0_10 = arith.constant 0 : index
    %c0_11 = arith.constant 0 : index
    %12 = vector.load %arg5[%c0_10, %c0_11] : memref<1x64xf32, #tpu.memory_space<vmem>>, vector<1x64xf32>
    %13 = vector.broadcast %12 : vector<1x64xf32> to vector<16x64xf32>
    %14 = arith.addf %11, %13 : vector<16x64xf32>
    %cst_12 = arith.constant 0.000000e+00 : f32
    %15 = vector.broadcast %cst_12 : f32 to vector<16x64xf32>
    %16 = arith.maximumf %14, %15 : vector<16x64xf32>
    %c0_13 = arith.constant 0 : index
    %c0_14 = arith.constant 0 : index
    %17 = vector.load %arg6[%c0_13, %c0_14] : memref<64x128xf32, #tpu.memory_space<vmem>>, vector<64x128xf32>
    %cst_15 = arith.constant dense<0.000000e+00> : vector<16x128xf32>
    %18 = tpu.matmul %16, %17, %cst_15 {dimension_numbers = #tpu.dot_dimension_numbers<[1], [0], [0], [1], [0, 0, 1, 1], [], []>} : vector<16x64xf32>, vector<64x128xf32>, vector<16x128xf32> -> vector<16x128xf32>
    %c0_16 = arith.constant 0 : index
    %c0_17 = arith.constant 0 : index
    %19 = vector.load %arg7[%c0_16, %c0_17] : memref<1x128xf32, #tpu.memory_space<vmem>>, vector<1x128xf32>
    %20 = vector.broadcast %19 : vector<1x128xf32> to vector<16x128xf32>
    %21 = arith.addf %18, %20 : vector<16x128xf32>
    %c0_18 = arith.constant 0 : index
    %c0_19 = arith.constant 0 : index
    %22 = vector.load %arg8[%c0_18, %c0_19] : memref<16x128xf32, #tpu.memory_space<vmem>>, vector<16x128xf32>
    tpu.vector_store %arg8[%c0_18, %c0_19], %21 {strides = array<i32>} : memref<16x128xf32, #tpu.memory_space<vmem>>, vector<16x128xf32>,
    return
  }
  func.func @transform_0(%arg0: i32) -> (i32, i32) {
    %c0_i32 = arith.constant 0 : i32
    %c0_i32_0 = arith.constant 0 : i32
    return %arg0, %c0_i32 : i32, i32
  }
  func.func @transform_1(%arg0: i32) -> (i32, i32) {
    %c0_i32 = arith.constant 0 : i32
    %c0_i32_0 = arith.constant 0 : i32
    %c0_i32_1 = arith.constant 0 : i32
    return %c0_i32, %c0_i32_0 : i32, i32
  }
  func.func @transform_2(%arg0: i32) -> (i32, i32) {
    %c0_i32 = arith.constant 0 : i32
    %c0_i32_0 = arith.constant 0 : i32
    %c0_i32_1 = arith.constant 0 : i32
    return %c0_i32, %c0_i32_0 : i32, i32
  }
  func.func @transform_3(%arg0: i32) -> (i32, i32) {
    %c0_i32 = arith.constant 0 : i32
    %c0_i32_0 = arith.constant 0 : i32
    %c0_i32_1 = arith.constant 0 : i32
    return %c0_i32, %c0_i32_0 : i32, i32
  }
  func.func @transform_4(%arg0: i32) -> (i32, i32) {
    %c0_i32 = arith.constant 0 : i32
    %c0_i32_0 = arith.constant 0 : i32
    %c0_i32_1 = arith.constant 0 : i32
    return %c0_i32, %c0_i32_0 : i32, i32
  }
  func.func @transform_5(%arg0: i32) -> (i32, i32) {
    %c0_i32 = arith.constant 0 : i32
    %c0_i32_0 = arith.constant 0 : i32
    %c0_i32_1 = arith.constant 0 : i32
    return %c0_i32, %c0_i32_0 : i32, i32
  }
  func.func @transform_6(%arg0: i32) -> (i32, i32) {
    %c0_i32 = arith.constant 0 : i32
    %c0_i32_0 = arith.constant 0 : i32
    %c0_i32_1 = arith.constant 0 : i32
    return %c0_i32, %c0_i32_0 : i32, i32
  }
  func.func @transform_7(%arg0: i32) -> (i32, i32) {
    %c0_i32 = arith.constant 0 : i32
    %c0_i32_0 = arith.constant 0 : i32
    return %arg0, %c0_i32 : i32, i32
  }
}

</mosaic_0001>

<bundles_post_ra>
// kernel: tpu_custom_call.1
= control target key start
LH: loop header
LB: loop body
LE: loop exit
PB: predicated region body
PF: predicated region fallthrough
CT: control target
= control target key end

     0   :  { %12 = vsyncpa [#allocation3], 0  ;;  %s797_s0 = inlined_call_operand.hbm [shape: f32[16,32], index: 0, kind: input, shape index: {}]   ;;  %s798_s1 = inlined_call_operand.hbm [shape: f32[32,64], index: 1, kind: input, shape index: {}]   ;;  %s799_s2 = inlined_call_operand.vmem [shape: f32[1,64], index: 2, kind: input, shape index: {}]   ;;  %s800_s3 = inlined_call_operand.hbm [shape: f32[64,64], index: 3, kind: input, shape index: {}]   ;;  %s801_s4 = inlined_call_operand.vmem [shape: f32[1,64], index: 4, kind: input, shape index: {}]   ;;  %s802_s5 = inlined_call_operand.hbm [shape: f32[64,128], index: 5, kind: input, shape index: {}]   ;;  %s803_s6 = inlined_call_operand.vmem [shape: f32[1,128], index: 6, kind: input, shape index: {}]   ;;  %s804_s7 = inlined_call_operand.hbm [shape: f32[16,128], index: 7, kind: output, shape index: {}]  }
   0x1   :  { %13 = vsyncpa [#allocation6], 0 }
   0x2   :  { %14 = vsyncpa [#allocation9], 0 }
   0x3   :  { %15 = vsyncpa [#allocation4], 0  ;;  %s646_s24 = smov [#allocation5]   ;;  %s647_s26 = smov [#allocation2]  }
   0x4   :  { %s33_s25 = sshll.u32 %s646_s24, 4  ;;  %s21_s27 = sshll.u32 %s647_s26, 4  ;;  %s34_s25 = int_to_ptr.vmem [resolvable:$true] %s33_s25  ;;  %s693_s27 = int_to_ptr.vmem [resolvable:$true] %s21_s27 }
   0x5   :  { %s528_s30 = scalar_lea.hbm %s798_s1, 512 }
   0x6   :  { %p529_p0 = scmp.ne.s32.totalorder %s798_s1, %s528_s30  ;;  %p532_p1 = scmp.lt.u32.totalorder %s528_s30, %s798_s1 }
   0x8   :  { %p534_p2 = pnand %p532_p1, %p529_p0 }
   0xa   :  { %537 = shalt.err (!%p534_p2)
}
   0xb   :  { %s538_s12 = scalar_lea.vmem %s34_s25, 512  ;;  %p543_p4 = scmp.lt.s32.totalorder %s34_s25, %s34_s25 }
   0xc   :  { %p539_p3 = scmp.ne.s32.totalorder %s34_s25, %s538_s12  ;;  %p544_p5 = scmp.lt.s32.totalorder %s538_s12, %s538_s12 }
   0xe   :  { %p545_p6 = por %p544_p5, %p543_p4 }
  0x10   :  { %p546_p7 = pnand %p545_p6, %p539_p3 }
  0x12   :  { %549 = shalt.err (!%p546_p7)
}
  0x13   :  { %s648_s13 = smov 128   ;;  %s649_s14 = smov 8  }
  0x14   :  { %39 = dma.hbm_to_vmem [thread:$0]  %s798_s1, 512, %s34_s25, [#allocation6], %s648_s13, %s648_s13, %s649_s14  }
  0x15   :  { %s550_s19 = scalar_lea.hbm %s797_s0, 256 }
  0x16   :  { %p551_p8 = scmp.ne.s32.totalorder %s797_s0, %s550_s19  ;;  %p554_p9 = scmp.lt.u32.totalorder %s550_s19, %s797_s0 }
  0x18   :  { %p556_p10 = pnand %p554_p9, %p551_p8 }
  0x1a   :  { %559 = shalt.err (!%p556_p10)
}
  0x1b   :  { %s560_s24 = scalar_lea.vmem %s693_s27, 256  ;;  %p565_p12 = scmp.lt.s32.totalorder %s693_s27, %s693_s27 }
  0x1c   :  { %p561_p11 = scmp.ne.s32.totalorder %s693_s27, %s560_s24  ;;  %p566_p13 = scmp.lt.s32.totalorder %s560_s24, %s560_s24 }
  0x1e   :  { %p567_p0 = por %p566_p13, %p565_p12 }
  0x20   :  { %p568_p1 = pnand %p567_p0, %p561_p11 }
  0x22   :  { %571 = shalt.err (!%p568_p1)
}
  0x23   :  { %27 = dma.hbm_to_vmem [thread:$0]  %s797_s0, 256, %s693_s27, [#allocation3], %s648_s13, %s648_s13, %s649_s14  }
  0x24   :  { %s650_s26 = smov [#allocation7]   ;;  %s651_s29 = smov [#allocation8]  }
  0x25   :  { %s47_s28 = sshll.u32 %s650_s26, 4  ;;  %s61_s30 = sshll.u32 %s651_s29, 4  ;;  %s48_s28 = int_to_ptr.vmem [resolvable:$true] %s47_s28  ;;  %s730_s30 = int_to_ptr.vmem [resolvable:$true] %s61_s30 }
  0x26   :  { %s572_s10 = scalar_lea.hbm %s800_s3, 1024 }
  0x27   :  { %p573_p2 = scmp.ne.s32.totalorder %s800_s3, %s572_s10  ;;  %p576_p3 = scmp.lt.u32.totalorder %s572_s10, %s800_s3 }
  0x29   :  { %p578_p4 = pnand %p576_p3, %p573_p2 }
  0x2b   :  { %581 = shalt.err (!%p578_p4)
}
  0x2c   :  { %s582_s0 = scalar_lea.vmem %s48_s28, 1024  ;;  %p587_p6 = scmp.lt.s32.totalorder %s48_s28, %s48_s28 }
  0x2d   :  { %p583_p5 = scmp.ne.s32.totalorder %s48_s28, %s582_s0  ;;  %p588_p7 = scmp.lt.s32.totalorder %s582_s0, %s582_s0 }
  0x2f   :  { %p589_p8 = por %p588_p7, %p587_p6 }
  0x31   :  { %p590_p9 = pnand %p589_p8, %p583_p5 }
  0x33   :  { %593 = shalt.err (!%p590_p9)
}
  0x34   :  { %53 = dma.hbm_to_vmem [thread:$0]  %s800_s3, 1024, %s48_s28, [#allocation6], %s648_s13, %s648_s13, %s649_s14  }
  0x35   :  { %s594_s20 = scalar_lea.hbm %s802_s5, 1024 }
  0x36   :  { %p595_p10 = scmp.ne.s32.totalorder %s802_s5, %s594_s20  ;;  %p598_p11 = scmp.lt.u32.totalorder %s594_s20, %s802_s5 }
  0x38   :  { %p600_p12 = pnand %p598_p11, %p595_p10 }
  0x3a   :  { %603 = shalt.err (!%p600_p12)
}
  0x3b   :  { %s604_s1 = scalar_lea.vmem %s730_s30, 1024  ;;  %p609_p0 = scmp.lt.s32.totalorder %s730_s30, %s730_s30 }
  0x3c   :  { %p605_p13 = scmp.ne.s32.totalorder %s730_s30, %s604_s1  ;;  %p610_p1 = scmp.lt.s32.totalorder %s604_s1, %s604_s1 }
  0x3e   :  { %p611_p2 = por %p610_p1, %p609_p0 }
  0x40   :  { %p612_p3 = pnand %p611_p2, %p605_p13 }
  0x42   :  { %615 = shalt.err (!%p612_p3)
}
  0x43   :  { %67 = dma.hbm_to_vmem [thread:$0]  %s802_s5, 1024, %s730_s30, [#allocation9], %s648_s13, %s648_s13, %s649_s14  }
  0x44   :  { %638 = dma.done.wait [#allocation3], 256  }
  0x45   :  { %639 = vsyncadd [#allocation3], 4294967040 }
  0x46   :  { %640 = dma.done.wait [#allocation6], 1536  }
  0x47   :  { %641 = vsyncadd [#allocation6], 4294965760 }
  0x48   :  { %642 = dma.done.wait [#allocation9], 1024  }
  0x49   :  { %643 = vsyncadd [#allocation9], 4294966272  ;;  %v86_v0 = vld [vmem:[#allocation5] sm:$0xff]  ;;  %v87_v1 = vld [vmem:[#allocation5 + $0x8] sm:$0xff]  ;;  %vm97_vm0 = vcmask 261120   ;;  %vm196_vm1 = vcmask 523264  }
  0x4a   :  { %v88_v2 = vld [vmem:[#allocation5 + $0x10] sm:$0xff]  ;;  %v481_v3 = vpack.c.bf16 %v87_v1, %v86_v0  ;;  %v89_v4 = vld [vmem:[#allocation5 + $0x18] sm:$0xff]  ;;  %v181_v8 = vld [vmem:[#allocation7] sm:$0xff]  ;;  %s652_s8 = smov [#allocation10]  }
  0x4b   :  { %v82_v5 = vld [vmem:[#allocation2] sm:$0xff]  ;;  %v485_v6 = vpack.c.bf16 %v89_v4, %v88_v2  ;;  %v182_v9 = vld [vmem:[#allocation7 + $0x8] sm:$0xff]  ;;  %v184_v12 = vld [vmem:[#allocation7 + $0x18] sm:$0xff]  ;;  %s383_s9 = sshll.u32 %s652_s8, 4  ;;  %s384_s9 = int_to_ptr.vmem [resolvable:$true] %s383_s9 }
  0x4c   :  { %v84_v7 = vmax.f32 %v82_v5, 0.0  ;;  %v183_v10 = vld [vmem:[#allocation7 + $0x10] sm:$0xff]  ;;  %482 = vmatprep.subr.bf16.mxu0 %v481_v3  ;;  %v489_v11 = vpack.c.bf16 %v182_v9, %v181_v8  ;;  %v83_v13 = vld [vmem:[#allocation2 + $0x8] sm:$0xff]  ;;  %v185_v15 = vld [vmem:[#allocation7 + $0x20] sm:$0xff]  ;;  %p621_p5 = scmp.lt.s32.totalorder %s384_s9, %s384_s9 }
  0x4d   :  { %484 = vmatpush3.bf16.msra.mxu0 %v481_v3  ;;  %v493_v14 = vpack.c.bf16 %v184_v12, %v183_v10  ;;  %v186_v16 = vld [vmem:[#allocation7 + $0x28] sm:$0xff]  ;;  %v85_v17 = vmax.f32 %v83_v13, 0.0  ;;  %v187_v19 = vld [vmem:[#allocation7 + $0x30] sm:$0xff]  ;;  %v188_v20 = vld [vmem:[#allocation7 + $0x38] sm:$0xff] }
  0x4e   :  { %440 = vmatprep.mubr.msk.f32.mxu0 %vm97_vm0, %v84_v7  ;;  %486 = vmatprep.subr.bf16.mxu0 %v485_v6  ;;  %v497_v18 = vpack.c.bf16 %v186_v16, %v185_v15  ;;  %v501_v21 = vpack.c.bf16 %v188_v20, %v187_v19  ;;  %v280_v22 = vld [vmem:[#allocation8] sm:$0xff]  ;;  %v281_v23 = vld [vmem:[#allocation8 + $0x8] sm:$0xff]  ;;  %v282_v24 = vld [vmem:[#allocation8 + $0x10] sm:$0xff] }
  0x4f   :  { %490 = vmatprep.subr.bf16.mxu1 %v489_v11  ;;  %v505_v25 = vpack.c.bf16 %v281_v23, %v280_v22  ;;  %v283_v26 = vld [vmem:[#allocation8 + $0x18] sm:$0xff]  ;;  %v284_v28 = vld [vmem:[#allocation8 + $0x20] sm:$0xff]  ;;  %v285_v29 = vld [vmem:[#allocation8 + $0x28] sm:$0xff] }
  0x50   :  { %492 = vmatpush3.bf16.msra.mxu1 %v489_v11  ;;  %v509_v27 = vpack.c.bf16 %v283_v26, %v282_v24  ;;  %v513_v30 = vpack.c.bf16 %v285_v29, %v284_v28  ;;  %v397_v31 = vld [vmem:[%s799_s2] ss:$0 sm:$0xff]  ;;  %v287_v39 = vld [vmem:[#allocation8 + $0x38] sm:$0xff] }
  0x51   :  { %494 = vmatprep.subr.bf16.mxu1 %v493_v14  ;;  %488 = vmatpush3.bf16.msra.mxu0 %v485_v6  ;;  %v286_v38 = vld [vmem:[#allocation8 + $0x30] sm:$0xff] }
  0x52   :  { %506 = vmatprep.subr.bf16.mxu0 %v505_v25  ;;  %v517_v40 = vpack.c.bf16 %v287_v39, %v286_v38  ;;  %v400_v41 = vld [vmem:[%s801_s4] ss:$0 sm:$0xff]  ;;  %s616_s4 = scalar_lea.vmem %s384_s9, 256 }
  0x53   :  { %v403_v48 = vld [vmem:[%s803_s6] ss:$0 sm:$0xff]  ;;  %p617_p4 = scmp.ne.s32.totalorder %s384_s9, %s616_s4  ;;  %p622_p6 = scmp.lt.s32.totalorder %s616_s4, %s616_s4 }
  0x54   :  { %496 = vmatpush3.bf16.msra.mxu1 %v493_v14  ;;  %441 = vmatmul.mubr.msk.f32.vlgmr.msra.gmra.mrb[0].mxu0 %vm97_vm0, %v85_v17 }
  0x55   :  { %498 = vmatprep.subr.bf16.mxu1 %v497_v18  ;;  %508 = vmatpush3.bf16.msra.mxu0 %v505_v25  ;;  %p623_p7 = por %p622_p6, %p621_p5 }
  0x56   :  { %510 = vmatprep.subr.bf16.mxu0 %v509_v27 }
  0x57   :  { %p624_p8 = pnand %p623_p7, %p617_p4 }
  0x58   :  { %500 = vmatpush3.bf16.msra.mxu1 %v497_v18 }
  0x59   :  { %502 = vmatprep.subr.bf16.mxu1 %v501_v21  ;;  %512 = vmatpush3.bf16.msra.mxu0 %v509_v27 }
  0x5a   :  { %514 = vmatprep.subr.bf16.mxu0 %v513_v30 }
  0x5c   :  { %504 = vmatpush3.bf16.msra.mxu1 %v501_v21 }
  0x5d   :  { %516 = vmatpush3.bf16.msra.mxu0 %v513_v30 }
  0x5e   :  { %518 = vmatprep.subr.bf16.mxu0 %v517_v40 }
  0x61   :  { %520 = vmatpush3.bf16.msra.mxu0 %v517_v40 }
 0x127   :  { %v442_v32 = vpop.f32.mrb[0].mxu0 }
 0x128   :  { %v176_v33 = vadd.f32 %v442_v32, %v397_v31  ;;  %v170_v34 = vpop.f32.mrb[1].mxu0 }
 0x129   :  { %v171_v35 = vadd.f32 %v397_v31, %v170_v34 }
 0x12a   :  { %v180_v37 = vmax.f32 %v176_v33, 0.0 }
 0x12b   :  { %v179_v36 = vmax.f32 %v171_v35, 0.0 }
 0x12d   :  { %459 = vmatprep.mubr.msk.f32.mxu1 %vm196_vm1, %v179_v36 }
 0x12e   :  { %460 = vmatmul.mubr.msk.f32.vlgmr.msra.gmra.mrb[0].mxu1 %vm196_vm1, %v180_v37 }
 0x201   :  { %v461_v42 = vpop.f32.mrb[0].mxu1 }
 0x202   :  { %v275_v43 = vadd.f32 %v461_v42, %v400_v41  ;;  %v269_v44 = vpop.f32.mrb[1].mxu1 }
 0x203   :  { %v270_v45 = vadd.f32 %v400_v41, %v269_v44 }
 0x204   :  { %v279_v47 = vmax.f32 %v275_v43, 0.0 }
 0x205   :  { %v278_v46 = vmax.f32 %v270_v45, 0.0 }
 0x207   :  { %478 = vmatprep.mubr.msk.f32.mxu0 %vm196_vm1, %v278_v46 }
 0x208   :  { %479 = vmatmul.mubr.msk.f32.vlgmr.msra.gmra.mrb[2].mxu0 %vm196_vm1, %v279_v47 }
 0x2db   :  { %v480_v49 = vpop.f32.mrb[2].mxu0 }
 0x2dc   :  { %v373_v50 = vadd.f32 %v480_v49, %v403_v48  ;;  %v367_v51 = vpop.f32.mrb[3].mxu0 }
 0x2dd   :  { %v368_v52 = vadd.f32 %v403_v48, %v367_v51 }
 0x2de   :  { %377 = vst [vmem:[#allocation10 + $0x8] sm:$0xff] %v373_v50 }
 0x2df   :  { %376 = vst [vmem:[#allocation10] sm:$0xff] %v368_v52 }
 0x2e0   :  { %627 = shalt.err (!%p624_p8)
}
 0x2e1   :  { %s628_s6 = scalar_lea.hbm %s804_s7, 256 }
 0x2e2   :  { %p629_p9 = scmp.ne.s32.totalorder %s804_s7, %s628_s6  ;;  %p632_p10 = scmp.lt.u32.totalorder %s628_s6, %s804_s7 }
 0x2e4   :  { %p634_p11 = pnand %p632_p10, %p629_p9 }
 0x2e6   :  { %637 = shalt.err (!%p634_p11)
}
 0x2e7   :  { %389 = dma.vmem_to_hbm [thread:$0]  %s384_s9, 256, %s804_s7, [#allocation4], %s648_s13, %s648_s13, %s649_s14  }
 0x2e8   :  { %644 = dma.done.wait [#allocation4], 256  }
 0x2e9   :  { %645 = vsyncadd [#allocation4], 4294967040 }
 0x2ea   :  { %393 = vsyncpa [#allocation3], 1 }
 0x2eb   :  { %394 = vsyncpa [#allocation6], 1 }
 0x2ec   :  { %395 = vsyncpa [#allocation9], 1 }
 0x2ed   :  { %396 = vsyncpa [#allocation4], 1 }

// kernel: tpu_custom_call.1
= control target key start
LH: loop header
LB: loop body
LE: loop exit
PB: predicated region body
PF: predicated region fallthrough
CT: control target
= control target key end

     0   :  { %12 = vsyncpa [#allocation3], 0  ;;  %s797_s0 = inlined_call_operand.hbm [shape: f32[16,32], index: 0, kind: input, shape index: {}]   ;;  %s798_s1 = inlined_call_operand.hbm [shape: f32[32,64], index: 1, kind: input, shape index: {}]   ;;  %s799_s2 = inlined_call_operand.vmem [shape: f32[1,64], index: 2, kind: input, shape index: {}]   ;;  %s800_s3 = inlined_call_operand.hbm [shape: f32[64,64], index: 3, kind: input, shape index: {}]   ;;  %s801_s4 = inlined_call_operand.vmem [shape: f32[1,64], index: 4, kind: input, shape index: {}]   ;;  %s802_s5 = inlined_call_operand.hbm [shape: f32[64,128], index: 5, kind: input, shape index: {}]   ;;  %s803_s6 = inlined_call_operand.vmem [shape: f32[1,128], index: 6, kind: input, shape index: {}]   ;;  %s804_s7 = inlined_call_operand.hbm [shape: f32[16,128], index: 7, kind: output, shape index: {}]  }
   0x1   :  { %13 = vsyncpa [#allocation6], 0 }
   0x2   :  { %14 = vsyncpa [#allocation9], 0 }
   0x3   :  { %15 = vsyncpa [#allocation4], 0  ;;  %s646_s24 = smov [#allocation5]   ;;  %s647_s26 = smov [#allocation2]  }
   0x4   :  { %s33_s25 = sshll.u32 %s646_s24, 4  ;;  %s21_s27 = sshll.u32 %s647_s26, 4  ;;  %s34_s25 = int_to_ptr.vmem [resolvable:$true] %s33_s25  ;;  %s693_s27 = int_to_ptr.vmem [resolvable:$true] %s21_s27 }
   0x5   :  { %s528_s30 = scalar_lea.hbm %s798_s1, 512 }
   0x6   :  { %p529_p0 = scmp.ne.s32.totalorder %s798_s1, %s528_s30  ;;  %p532_p1 = scmp.lt.u32.totalorder %s528_s30, %s798_s1 }
   0x8   :  { %p534_p2 = pnand %p532_p1, %p529_p0 }
   0xa   :  { %537 = shalt.err (!%p534_p2)
}
   0xb   :  { %s538_s12 = scalar_lea.vmem %s34_s25, 512  ;;  %p543_p4 = scmp.lt.s32.totalorder %s34_s25, %s34_s25 }
   0xc   :  { %p539_p3 = scmp.ne.s32.totalorder %s34_s25, %s538_s12  ;;  %p544_p5 = scmp.lt.s32.totalorder %s538_s12, %s538_s12 }
   0xe   :  { %p545_p6 = por %p544_p5, %p543_p4 }
  0x10   :  { %p546_p7 = pnand %p545_p6, %p539_p3 }
  0x12   :  { %549 = shalt.err (!%p546_p7)
}
  0x13   :  { %s648_s13 = smov 128   ;;  %s649_s14 = smov 8  }
  0x14   :  { %39 = dma.hbm_to_vmem [thread:$0]  %s798_s1, 512, %s34_s25, [#allocation6], %s648_s13, %s648_s13, %s649_s14  }
  0x15   :  { %s550_s19 = scalar_lea.hbm %s797_s0, 256 }
  0x16   :  { %p551_p8 = scmp.ne.s32.totalorder %s797_s0, %s550_s19  ;;  %p554_p9 = scmp.lt.u32.totalorder %s550_s19, %s797_s0 }
  0x18   :  { %p556_p10 = pnand %p554_p9, %p551_p8 }
  0x1a   :  { %559 = shalt.err (!%p556_p10)
}
  0x1b   :  { %s560_s24 = scalar_lea.vmem %s693_s27, 256  ;;  %p565_p12 = scmp.lt.s32.totalorder %s693_s27, %s693_s27 }
  0x1c   :  { %p561_p11 = scmp.ne.s32.totalorder %s693_s27, %s560_s24  ;;  %p566_p13 = scmp.lt.s32.totalorder %s560_s24, %s560_s24 }
  0x1e   :  { %p567_p0 = por %p566_p13, %p565_p12 }
  0x20   :  { %p568_p1 = pnand %p567_p0, %p561_p11 }
  0x22   :  { %571 = shalt.err (!%p568_p1)
}
  0x23   :  { %27 = dma.hbm_to_vmem [thread:$0]  %s797_s0, 256, %s693_s27, [#allocation3], %s648_s13, %s648_s13, %s649_s14  }
  0x24   :  { %s650_s26 = smov [#allocation7]   ;;  %s651_s29 = smov [#allocation8]  }
  0x25   :  { %s47_s28 = sshll.u32 %s650_s26, 4  ;;  %s61_s30 = sshll.u32 %s651_s29, 4  ;;  %s48_s28 = int_to_ptr.vmem [resolvable:$true] %s47_s28  ;;  %s730_s30 = int_to_ptr.vmem [resolvable:$true] %s61_s30 }
  0x26   :  { %s572_s10 = scalar_lea.hbm %s800_s3, 1024 }
  0x27   :  { %p573_p2 = scmp.ne.s32.totalorder %s800_s3, %s572_s10  ;;  %p576_p3 = scmp.lt.u32.totalorder %s572_s10, %s800_s3 }
  0x29   :  { %p578_p4 = pnand %p576_p3, %p573_p2 }
  0x2b   :  { %581 = shalt.err (!%p578_p4)
}
  0x2c   :  { %s582_s0 = scalar_lea.vmem %s48_s28, 1024  ;;  %p587_p6 = scmp.lt.s32.totalorder %s48_s28, %s48_s28 }
  0x2d   :  { %p583_p5 = scmp.ne.s32.totalorder %s48_s28, %s582_s0  ;;  %p588_p7 = scmp.lt.s32.totalorder %s582_s0, %s582_s0 }
  0x2f   :  { %p589_p8 = por %p588_p7, %p587_p6 }
  0x31   :  { %p590_p9 = pnand %p589_p8, %p583_p5 }
  0x33   :  { %593 = shalt.err (!%p590_p9)
}
  0x34   :  { %53 = dma.hbm_to_vmem [thread:$0]  %s800_s3, 1024, %s48_s28, [#allocation6], %s648_s13, %s648_s13, %s649_s14  }
  0x35   :  { %s594_s20 = scalar_lea.hbm %s802_s5, 1024 }
  0x36   :  { %p595_p10 = scmp.ne.s32.totalorder %s802_s5, %s594_s20  ;;  %p598_p11 = scmp.lt.u32.totalorder %s594_s20, %s802_s5 }
  0x38   :  { %p600_p12 = pnand %p598_p11, %p595_p10 }
  0x3a   :  { %603 = shalt.err (!%p600_p12)
}
  0x3b   :  { %s604_s1 = scalar_lea.vmem %s730_s30, 1024  ;;  %p609_p0 = scmp.lt.s32.totalorder %s730_s30, %s730_s30 }
  0x3c   :  { %p605_p13 = scmp.ne.s32.totalorder %s730_s30, %s604_s1  ;;  %p610_p1 = scmp.lt.s32.totalorder %s604_s1, %s604_s1 }
  0x3e   :  { %p611_p2 = por %p610_p1, %p609_p0 }
  0x40   :  { %p612_p3 = pnand %p611_p2, %p605_p13 }
  0x42   :  { %615 = shalt.err (!%p612_p3)
}
  0x43   :  { %67 = dma.hbm_to_vmem [thread:$0]  %s802_s5, 1024, %s730_s30, [#allocation9], %s648_s13, %s648_s13, %s649_s14  }
  0x44   :  { %638 = dma.done.wait [#allocation3], 256  }
  0x45   :  { %639 = vsyncadd [#allocation3], 4294967040 }
  0x46   :  { %640 = dma.done.wait [#allocation6], 1536  }
  0x47   :  { %641 = vsyncadd [#allocation6], 4294965760 }
  0x48   :  { %642 = dma.done.wait [#allocation9], 1024  }
  0x49   :  { %643 = vsyncadd [#allocation9], 4294966272  ;;  %v86_v0 = vld [vmem:[#allocation5] sm:$0xff]  ;;  %v87_v1 = vld [vmem:[#allocation5 + $0x8] sm:$0xff]  ;;  %vm97_vm0 = vcmask 261120   ;;  %vm196_vm1 = vcmask 523264  }
  0x4a   :  { %v88_v2 = vld [vmem:[#allocation5 + $0x10] sm:$0xff]  ;;  %v481_v3 = vpack.c.bf16 %v87_v1, %v86_v0  ;;  %v89_v4 = vld [vmem:[#allocation5 + $0x18] sm:$0xff]  ;;  %v181_v8 = vld [vmem:[#allocation7] sm:$0xff]  ;;  %s652_s8 = smov [#allocation10]  }
  0x4b   :  { %v82_v5 = vld [vmem:[#allocation2] sm:$0xff]  ;;  %v485_v6 = vpack.c.bf16 %v89_v4, %v88_v2  ;;  %v182_v9 = vld [vmem:[#allocation7 + $0x8] sm:$0xff]  ;;  %v184_v12 = vld [vmem:[#allocation7 + $0x18] sm:$0xff]  ;;  %s383_s9 = sshll.u32 %s652_s8, 4  ;;  %s384_s9 = int_to_ptr.vmem [resolvable:$true] %s383_s9 }
  0x4c   :  { %v84_v7 = vmax.f32 %v82_v5, 0.0  ;;  %v183_v10 = vld [vmem:[#allocation7 + $0x10] sm:$0xff]  ;;  %482 = vmatprep.subr.bf16.mxu0 %v481_v3  ;;  %v489_v11 = vpack.c.bf16 %v182_v9, %v181_v8  ;;  %v83_v13 = vld [vmem:[#allocation2 + $0x8] sm:$0xff]  ;;  %v185_v15 = vld [vmem:[#allocation7 + $0x20] sm:$0xff]  ;;  %p621_p5 = scmp.lt.s32.totalorder %s384_s9, %s384_s9 }
  0x4d   :  { %484 = vmatpush3.bf16.msra.mxu0 %v481_v3  ;;  %v493_v14 = vpack.c.bf16 %v184_v12, %v183_v10  ;;  %v186_v16 = vld [vmem:[#allocation7 + $0x28] sm:$0xff]  ;;  %v85_v17 = vmax.f32 %v83_v13, 0.0  ;;  %v187_v19 = vld [vmem:[#allocation7 + $0x30] sm:$0xff]  ;;  %v188_v20 = vld [vmem:[#allocation7 + $0x38] sm:$0xff] }
  0x4e   :  { %440 = vmatprep.mubr.msk.f32.mxu0 %vm97_vm0, %v84_v7  ;;  %486 = vmatprep.subr.bf16.mxu0 %v485_v6  ;;  %v497_v18 = vpack.c.bf16 %v186_v16, %v185_v15  ;;  %v501_v21 = vpack.c.bf16 %v188_v20, %v187_v19  ;;  %v280_v22 = vld [vmem:[#allocation8] sm:$0xff]  ;;  %v281_v23 = vld [vmem:[#allocation8 + $0x8] sm:$0xff]  ;;  %v282_v24 = vld [vmem:[#allocation8 + $0x10] sm:$0xff] }
  0x4f   :  { %490 = vmatprep.subr.bf16.mxu1 %v489_v11  ;;  %v505_v25 = vpack.c.bf16 %v281_v23, %v280_v22  ;;  %v283_v26 = vld [vmem:[#allocation8 + $0x18] sm:$0xff]  ;;  %v284_v28 = vld [vmem:[#allocation8 + $0x20] sm:$0xff]  ;;  %v285_v29 = vld [vmem:[#allocation8 + $0x28] sm:$0xff] }
  0x50   :  { %492 = vmatpush3.bf16.msra.mxu1 %v489_v11  ;;  %v509_v27 = vpack.c.bf16 %v283_v26, %v282_v24  ;;  %v513_v30 = vpack.c.bf16 %v285_v29, %v284_v28  ;;  %v397_v31 = vld [vmem:[%s799_s2] ss:$0 sm:$0xff]  ;;  %v287_v39 = vld [vmem:[#allocation8 + $0x38] sm:$0xff] }
  0x51   :  { %494 = vmatprep.subr.bf16.mxu1 %v493_v14  ;;  %488 = vmatpush3.bf16.msra.mxu0 %v485_v6  ;;  %v286_v38 = vld [vmem:[#allocation8 + $0x30] sm:$0xff] }
  0x52   :  { %506 = vmatprep.subr.bf16.mxu0 %v505_v25  ;;  %v517_v40 = vpack.c.bf16 %v287_v39, %v286_v38  ;;  %v400_v41 = vld [vmem:[%s801_s4] ss:$0 sm:$0xff]  ;;  %s616_s4 = scalar_lea.vmem %s384_s9, 256 }
  0x53   :  { %v403_v48 = vld [vmem:[%s803_s6] ss:$0 sm:$0xff]  ;;  %p617_p4 = scmp.ne.s32.totalorder %s384_s9, %s616_s4  ;;  %p622_p6 = scmp.lt.s32.totalorder %s616_s4, %s616_s4 }
  0x54   :  { %496 = vmatpush3.bf16.msra.mxu1 %v493_v14  ;;  %441 = vmatmul.mubr.msk.f32.vlgmr.msra.gmra.mrb[0].mxu0 %vm97_vm0, %v85_v17 }
  0x55   :  { %498 = vmatprep.subr.bf16.mxu1 %v497_v18  ;;  %508 = vmatpush3.bf16.msra.mxu0 %v505_v25  ;;  %p623_p7 = por %p622_p6, %p621_p5 }
  0x56   :  { %510 = vmatprep.subr.bf16.mxu0 %v509_v27 }
  0x57   :  { %p624_p8 = pnand %p623_p7, %p617_p4 }
  0x58   :  { %500 = vmatpush3.bf16.msra.mxu1 %v497_v18 }
  0x59   :  { %502 = vmatprep.subr.bf16.mxu1 %v501_v21  ;;  %512 = vmatpush3.bf16.msra.mxu0 %v509_v27 }
  0x5a   :  { %514 = vmatprep.subr.bf16.mxu0 %v513_v30 }
  0x5c   :  { %504 = vmatpush3.bf16.msra.mxu1 %v501_v21 }
  0x5d   :  { %516 = vmatpush3.bf16.msra.mxu0 %v513_v30 }
  0x5e   :  { %518 = vmatprep.subr.bf16.mxu0 %v517_v40 }
  0x61   :  { %520 = vmatpush3.bf16.msra.mxu0 %v517_v40 }
 0x127   :  { %v442_v32 = vpop.f32.mrb[0].mxu0 }
 0x128   :  { %v176_v33 = vadd.f32 %v442_v32, %v397_v31  ;;  %v170_v34 = vpop.f32.mrb[1].mxu0 }
 0x129   :  { %v171_v35 = vadd.f32 %v397_v31, %v170_v34 }
 0x12a   :  { %v180_v37 = vmax.f32 %v176_v33, 0.0 }
 0x12b   :  { %v179_v36 = vmax.f32 %v171_v35, 0.0 }
 0x12d   :  { %459 = vmatprep.mubr.msk.f32.mxu1 %vm196_vm1, %v179_v36 }
 0x12e   :  { %460 = vmatmul.mubr.msk.f32.vlgmr.msra.gmra.mrb[0].mxu1 %vm196_vm1, %v180_v37 }
 0x201   :  { %v461_v42 = vpop.f32.mrb[0].mxu1 }
 0x202   :  { %v275_v43 = vadd.f32 %v461_v42, %v400_v41  ;;  %v269_v44 = vpop.f32.mrb[1].mxu1 }
 0x203   :  { %v270_v45 = vadd.f32 %v400_v41, %v269_v44 }
 0x204   :  { %v279_v47 = vmax.f32 %v275_v43, 0.0 }
 0x205   :  { %v278_v46 = vmax.f32 %v270_v45, 0.0 }
 0x207   :  { %478 = vmatprep.mubr.msk.f32.mxu0 %vm196_vm1, %v278_v46 }
 0x208   :  { %479 = vmatmul.mubr.msk.f32.vlgmr.msra.gmra.mrb[2].mxu0 %vm196_vm1, %v279_v47 }
 0x2db   :  { %v480_v49 = vpop.f32.mrb[2].mxu0 }
 0x2dc   :  { %v373_v50 = vadd.f32 %v480_v49, %v403_v48  ;;  %v367_v51 = vpop.f32.mrb[3].mxu0 }
 0x2dd   :  { %v368_v52 = vadd.f32 %v403_v48, %v367_v51 }
 0x2de   :  { %377 = vst [vmem:[#allocation10 + $0x8] sm:$0xff] %v373_v50 }
 0x2df   :  { %376 = vst [vmem:[#allocation10] sm:$0xff] %v368_v52 }
 0x2e0   :  { %627 = shalt.err (!%p624_p8)
}
 0x2e1   :  { %s628_s6 = scalar_lea.hbm %s804_s7, 256 }
 0x2e2   :  { %p629_p9 = scmp.ne.s32.totalorder %s804_s7, %s628_s6  ;;  %p632_p10 = scmp.lt.u32.totalorder %s628_s6, %s804_s7 }
 0x2e4   :  { %p634_p11 = pnand %p632_p10, %p629_p9 }
 0x2e6   :  { %637 = shalt.err (!%p634_p11)
}
 0x2e7   :  { %389 = dma.vmem_to_hbm [thread:$0]  %s384_s9, 256, %s804_s7, [#allocation4], %s648_s13, %s648_s13, %s649_s14  }
 0x2e8   :  { %644 = dma.done.wait [#allocation4], 256  }
 0x2e9   :  { %645 = vsyncadd [#allocation4], 4294967040 }
 0x2ea   :  { %393 = vsyncpa [#allocation3], 1 }
 0x2eb   :  { %394 = vsyncpa [#allocation6], 1 }
 0x2ec   :  { %395 = vsyncpa [#allocation9], 1 }
 0x2ed   :  { %396 = vsyncpa [#allocation4], 1 }

</bundles_post_ra>
